<compile_context>
chip_gen: v7x
topology: tpu7x:2x2x1
jax: 0.10.0
libtpu: 0.0.40
codegen_flags: <defaults>
</compile_context>

<pallas_src>
import functools

import jax
import jax.numpy as jnp
from jax.experimental import pallas as pl
from jax.experimental.pallas import tpu as pltpu


# ----------------------------------------------------------------------------- 
# Shared per-row focal-loss math (one (tile_n, C) block -> (tile_n, 1) losses).
# -----------------------------------------------------------------------------
def _per_row_focal(x_ref, t_ref, *, alpha, gamma):
    x = x_ref[...].astype(jnp.float32)          # (tile_n, C), compute in f32
    t = t_ref[...]                              # (tile_n, 1) int32
    C = x.shape[-1]

    # Hoisted (1, C) class-index iota; the == broadcasts against t (tile_n, 1),
    # so no (tile_n, C) int32 iota is materialized.
    col_ids = jax.lax.broadcasted_iota(jnp.int32, (1, C), 1)

    # Both reductions below read the raw x block in the same traversal.
    tgt_logit = jnp.sum(jnp.where(col_ids == t, x, 0.0), axis=-1, keepdims=True)
    m = jnp.max(x, axis=-1, keepdims=True)                                # (tile_n, 1)

    # Numerically stable log-sum-exp (second traversal).
    lse = m + jnp.log(jnp.sum(jnp.exp(x - m), axis=-1, keepdims=True))    # (tile_n, 1)

    ce = lse - tgt_logit                        # per-sample CE loss
    pt = jnp.exp(-ce)
    one_minus_pt = jnp.maximum(1.0 - pt, 0.0)   # clamp: avoids pow/log NaN hazard

    g = float(gamma)
    if g == 0.0:
        w = jnp.ones_like(one_minus_pt)
    elif g == int(g) and 1 <= int(g) <= 8:
        # Integer gamma: repeated VPU multiply instead of exp/log pow on the EUP.
        w = one_minus_pt
        for _ in range(int(g) - 1):
            w = w * one_minus_pt
    else:
        w = one_minus_pt ** g

    return alpha * w * ce                       # (tile_n, 1)


# -----------------------------------------------------------------------------
# Kernel 1: per-tile partial sum (used for reduction='mean'/'sum').
# Each grid step writes its own (1,1,1) output -> grid stays "parallel".
# -----------------------------------------------------------------------------
def _focal_tile_sum_kernel(x_ref, t_ref, out_ref, *, alpha, gamma, n_valid):
    i = pl.program_id(0)
    tile_rows = x_ref.shape[0]
    focal = _per_row_focal(x_ref, t_ref, alpha=alpha, gamma=gamma)   # (tile_n, 1)

    rem = n_valid % tile_rows   # static Python int
    if rem == 0:
        out_ref[0] = jnp.sum(focal, axis=0, keepdims=True)           # (1, 1)
    else:
        last = pl.num_programs(0) - 1

        @pl.when(i != last)
        def _():
            out_ref[0] = jnp.sum(focal, axis=0, keepdims=True)

        @pl.when(i == last)
        def _():
            # Mask rows past the true batch size (partial last block reads padding).
            row_ids = jax.lax.broadcasted_iota(jnp.int32, focal.shape, 0)
            out_ref[0] = jnp.sum(jnp.where(row_ids < rem, focal, 0.0),
                                 axis=0, keepdims=True)


# -----------------------------------------------------------------------------
# Kernel 2: per-row losses (used for reduction='none').
# -----------------------------------------------------------------------------
def _focal_rows_kernel(x_ref, t_ref, out_ref, *, alpha, gamma, n_valid):
    i = pl.program_id(0)
    tile_rows = x_ref.shape[0]
    focal = _per_row_focal(x_ref, t_ref, alpha=alpha, gamma=gamma)   # (tile_n, 1)

    rem = n_valid % tile_rows   # static Python int
    if rem == 0:
        out_ref[...] = focal
    else:
        last = pl.num_programs(0) - 1

        @pl.when(i != last)
        def _():
            out_ref[...] = focal

        @pl.when(i == last)
        def _():
            row_ids = jax.lax.broadcasted_iota(jnp.int32, focal.shape, 0)
            out_ref[...] = jnp.where(row_ids < rem, focal, 0.0)


# -----------------------------------------------------------------------------
# Tile-size / VMEM-budget selection.
# -----------------------------------------------------------------------------
def _vmem_capacity_bytes():
    """Physical VMEM of the local chip; conservative v7x value (64 MiB) on failure."""
    try:
        info = pltpu.get_tpu_info()
        v = getattr(info, "vmem_capacity_bytes", None)
        if v:
            return int(v)
    except Exception:
        pass
    return 64 * 1024 * 1024


def _per_row_vmem_bytes(c, itemsize):
    """VMEM bytes per logits row: double-buffered input block (lane-padded to 128)
    plus ~2 f32 elementwise temporaries plus slack for targets/output columns."""
    c_pad = -(-c // 128) * 128
    return 2 * c_pad * itemsize + 2 * c_pad * 4 + 512


def _choose_tile_n(n, c, itemsize, *, target_block_bytes=4 * 1024 * 1024):
    """Row tile sized for multi-MiB HBM blocks under a generation-aware VMEM budget."""
    padded_n = -(-n // 8) * 8
    vmem_budget = _vmem_capacity_bytes() // 2         # leave half for Mosaic scratch etc.

    per_row = _per_row_vmem_bytes(c, itemsize)
    tile_vmem_cap = max(vmem_budget // per_row, 8)
    # Rows needed for a ~target_block_bytes HBM read per grid step.
    tile_hbm_target = max(512, target_block_bytes // max(c * itemsize, 1))

    tile = min(int(tile_vmem_cap), int(tile_hbm_target), padded_n)
    tile -= tile % 8
    tile = max(tile, 8)

    # Megacore (v7x has 2 TCs): prefer >= 2 grid steps when each half-block
    # still reads >= ~1 MiB from HBM.
    if tile >= padded_n:
        half = -(-(padded_n // 2) // 8) * 8
        if half >= 8 and half * c * itemsize >= (1 << 20):
            tile = half
    return tile


# -----------------------------------------------------------------------------
# Wrapper.
# -----------------------------------------------------------------------------
def focal_loss(inputs, targets, *, alpha=1.0, gamma=2.0, reduction="mean",
               tile_n=None):
    """Pallas implementation of FocalLoss.forward for (N, C) logits + (N,) targets.

    Works with f32 or bf16 logits (compute is always f32 inside the kernel).
    Note: out-of-range targets silently select a 0 target-logit instead of raising,
    and alpha is a single scalar (matching the reference module).
    """
    N, C = inputs.shape
    itemsize = inputs.dtype.itemsize
    if tile_n is None:
        tile_n = _choose_tile_n(N, C, itemsize)
    assert tile_n % 8 == 0, "tile_n must be a multiple of 8 (sublane alignment)"

    num_tiles = pl.cdiv(N, tile_n)
    t2d = targets.astype(jnp.int32).reshape(N, 1)

    # vmem_limit from the actual footprint (+8 MiB headroom), clamped to 3/4 physical.
    vmem_phys = _vmem_capacity_bytes()
    vmem_need = tile_n * _per_row_vmem_bytes(C, itemsize)
    vmem_limit = int(max(16 << 20, min(vmem_phys * 3 // 4, vmem_need + (8 << 20))))

    cost = pl.CostEstimate(
        flops=int(6 * N * C),
        transcendentals=int(N * C + 3 * N),
        bytes_accessed=int(N * C * itemsize + 2 * N * 4))

    cparams = pltpu.CompilerParams(
        dimension_semantics=("parallel",),     # independent tiles -> dual-TC on v7x
        vmem_limit_bytes=vmem_limit)

    in_specs = [
        pl.BlockSpec((tile_n, C), lambda i: (i, 0)),
        pl.BlockSpec((tile_n, 1), lambda i: (i, 0)),
    ]

    if reduction in ("mean", "sum"):
        kernel = functools.partial(_focal_tile_sum_kernel, alpha=float(alpha),
                                   gamma=float(gamma), n_valid=N)
        partial_sums = pl.pallas_call(
            kernel,
            out_shape=jax.ShapeDtypeStruct((num_tiles, 1, 1), jnp.float32),
            grid_spec=pltpu.PrefetchScalarGridSpec(
                num_scalar_prefetch=0,
                grid=(num_tiles,),
                in_specs=in_specs,
                out_specs=pl.BlockSpec((1, 1, 1), lambda i: (i, 0, 0)),
            ),
            compiler_params=cparams,
            cost_estimate=cost,
        )(inputs, t2d)
        total = jnp.sum(partial_sums)          # tiny (num_tiles,) reduce in XLA
        if reduction == "mean":
            return total / N
        return total

    # reduction == 'none': per-row losses.
    kernel = functools.partial(_focal_rows_kernel, alpha=float(alpha),
                               gamma=float(gamma), n_valid=N)
    per_row = pl.pallas_call(
        kernel,
        out_shape=jax.ShapeDtypeStruct((num_tiles * tile_n, 1), jnp.float32),
        grid_spec=pltpu.PrefetchScalarGridSpec(
            num_scalar_prefetch=0,
            grid=(num_tiles,),
            in_specs=in_specs,
            out_specs=pl.BlockSpec((tile_n, 1), lambda i: (i, 0)),
        ),
        compiler_params=cparams,
        cost_estimate=cost,
    )(inputs, t2d)
    return per_row[:N, 0]


# -----------------------------------------------------------------------------
# Pure-JAX reference mirroring the PyTorch module.
# -----------------------------------------------------------------------------
def _reference_focal_loss(inputs, targets, alpha=1.0, gamma=2.0, reduction="mean"):
    logp = jax.nn.log_softmax(inputs.astype(jnp.float32), axis=-1)
    ce = -jnp.take_along_axis(logp, targets[:, None].astype(jnp.int32), axis=-1)[:, 0]
    pt = jnp.exp(-ce)
    focal = alpha * (1.0 - pt) ** gamma * ce
    if reduction == "mean":
        return focal.mean()
    if reduction == "sum":
        return focal.sum()
    return focal


if __name__ == "__main__":
    key = jax.random.PRNGKey(0)
    k1, k2, k3, k4 = jax.random.split(key, 4)

    # Small smoke-test shapes.
    N, C = 32, 16
    logits = jax.random.normal(k1, (N, C), dtype=jnp.float32)
    targets = jax.random.randint(k2, (N,), 0, C, dtype=jnp.int32)

    out_mean = jax.block_until_ready(
        focal_loss(logits, targets, alpha=1.0, gamma=2.0, reduction="mean"))
    ref_mean = _reference_focal_loss(logits, targets)
    assert jnp.allclose(out_mean, ref_mean, rtol=1e-5, atol=1e-5), (out_mean, ref_mean)

    out_sum = jax.block_until_ready(focal_loss(logits, targets, reduction="sum"))
    ref_sum = _reference_focal_loss(logits, targets, reduction="sum")
    assert jnp.allclose(out_sum, ref_sum, rtol=1e-5, atol=1e-5), (out_sum, ref_sum)

    out_none = jax.block_until_ready(focal_loss(logits, targets, reduction="none"))
    ref_none = _reference_focal_loss(logits, targets, reduction="none")
    assert jnp.allclose(out_none, ref_none, rtol=1e-5, atol=1e-5)

    # Ragged batch + explicit small tile: exercises the multi-step parallel grid
    # and the pl.when-gated tail mask on both kernels.
    N2, C2 = 30, 16
    logits2 = jax.random.normal(k3, (N2, C2), dtype=jnp.float32)
    targets2 = jax.random.randint(k4, (N2,), 0, C2, dtype=jnp.int32)

    out2 = jax.block_until_ready(
        focal_loss(logits2, targets2, reduction="mean", tile_n=8))
    ref2 = _reference_focal_loss(logits2, targets2)
    assert jnp.allclose(out2, ref2, rtol=1e-5, atol=1e-5), (out2, ref2)

    out2n = jax.block_until_ready(
        focal_loss(logits2, targets2, reduction="none", tile_n=8))
    ref2n = _reference_focal_loss(logits2, targets2, reduction="none")
    assert jnp.allclose(out2n, ref2n, rtol=1e-5, atol=1e-5)

    # Default auto tile on the ragged batch (single tile, tail-mask path).
    out3 = jax.block_until_ready(focal_loss(logits2, targets2, reduction="sum"))
    ref3 = _reference_focal_loss(logits2, targets2, reduction="sum")
    assert jnp.allclose(out3, ref3, rtol=1e-5, atol=1e-5), (out3, ref3)

    print("KERNEL_OK")
</pallas_src>

<mosaic_0001>
module attributes {stable_mosaic.version = 11 : i64} {
  func.func @_focal_tile_sum_kernel(%arg0: i32, %arg1: memref<32x16xf32, #tpu.memory_space<vmem>>, %arg2: memref<32x1xi32, #tpu.memory_space<vmem>>, %arg3: memref<1x1x1xf32, #tpu.memory_space<vmem>>) attributes {dimension_semantics = [#tpu.dimension_semantics<parallel>], iteration_bounds = array<i64: 1>, scalar_prefetch = 0 : i64, scratch_operands = 0 : i64, tpu.core_type = #tpu.core_type<tc>, window_params = [{transform_indices = @transform_0, window_bounds = array<i64: 32, 16>}, {transform_indices = @transform_1, window_bounds = array<i64: 32, 1>}, {transform_indices = @transform_2, window_bounds = array<i64: 1, 1, 1>}]} {
    %c0 = arith.constant 0 : index
    %c0_0 = arith.constant 0 : index
    %0 = vector.load %arg1[%c0, %c0_0] : memref<32x16xf32, #tpu.memory_space<vmem>>, vector<32x16xf32>
    %c0_1 = arith.constant 0 : index
    %c0_2 = arith.constant 0 : index
    %1 = vector.load %arg2[%c0_1, %c0_2] : memref<32x1xi32, #tpu.memory_space<vmem>>, vector<32x1xi32>
    %2 = tpu.iota {dimensions = array<i32: 1>} : vector<1x16xi32>
    %3 = vector.broadcast %2 : vector<1x16xi32> to vector<32x16xi32>
    %4 = vector.broadcast %1 : vector<32x1xi32> to vector<32x16xi32>
    %5 = arith.cmpi eq, %3, %4 : vector<32x16xi32>
    %cst = arith.constant 0.000000e+00 : f32
    %6 = vector.broadcast %cst : f32 to vector<32x16xf32>
    %7 = arith.select %5, %0, %6 : vector<32x16xi1>, vector<32x16xf32>
    %cst_3 = arith.constant dense<0.000000e+00> : vector<32xf32>
    %8 = vector.multi_reduction <add>, %7, %cst_3 [1] : vector<32x16xf32> to vector<32xf32>
    %9 = vector.shape_cast %8 : vector<32xf32> to vector<32x1xf32>
    %cst_4 = arith.constant dense<0xFF800000> : vector<32xf32>
    %10 = vector.multi_reduction <maximumf>, %0, %cst_4 [1] : vector<32x16xf32> to vector<32xf32>
    %11 = vector.shape_cast %10 : vector<32xf32> to vector<32x1xf32>
    %12 = vector.broadcast %11 : vector<32x1xf32> to vector<32x16xf32>
    %13 = arith.subf %0, %12 : vector<32x16xf32>
    %14 = math.exp %13 : vector<32x16xf32>
    %cst_5 = arith.constant dense<0.000000e+00> : vector<32xf32>
    %15 = vector.multi_reduction <add>, %14, %cst_5 [1] : vector<32x16xf32> to vector<32xf32>
    %16 = vector.shape_cast %15 : vector<32xf32> to vector<32x1xf32>
    %17 = math.log %16 : vector<32x1xf32>
    %18 = arith.addf %11, %17 : vector<32x1xf32>
    %19 = arith.subf %18, %9 : vector<32x1xf32>
    %cst_6 = arith.constant 0.000000e+00 : f32
    %20 = vector.broadcast %cst_6 : f32 to vector<32x1xf32>
    %21 = arith.subf %20, %19 : vector<32x1xf32>
    %22 = math.exp %21 : vector<32x1xf32>
    %cst_7 = arith.constant 1.000000e+00 : f32
    %23 = vector.broadcast %cst_7 : f32 to vector<32x1xf32>
    %24 = arith.subf %23, %22 : vector<32x1xf32>
    %cst_8 = arith.constant 0.000000e+00 : f32
    %25 = vector.broadcast %cst_8 : f32 to vector<32x1xf32>
    %26 = arith.maximumf %24, %25 : vector<32x1xf32>
    %27 = arith.mulf %26, %26 : vector<32x1xf32>
    %cst_9 = arith.constant 1.000000e+00 : f32
    %28 = vector.broadcast %cst_9 : f32 to vector<32x1xf32>
    %29 = arith.mulf %28, %27 : vector<32x1xf32>
    %30 = arith.mulf %29, %19 : vector<32x1xf32>
    %cst_10 = arith.constant dense<0.000000e+00> : vector<1xf32>
    %31 = vector.multi_reduction <add>, %30, %cst_10 [0] : vector<32x1xf32> to vector<1xf32>
    %32 = vector.shape_cast %31 : vector<1xf32> to vector<1x1xf32>
    %c0_11 = arith.constant 0 : index
    %c0_12 = arith.constant 0 : index
    %c0_13 = arith.constant 0 : index
    %33 = vector.load %arg3[%c0_11, %c0_12, %c0_13] : memref<1x1x1xf32, #tpu.memory_space<vmem>>, vector<1x1x1xf32>
    %34 = vector.shape_cast %33 : vector<1x1x1xf32> to vector<1x1xf32>
    %35 = vector.shape_cast %32 : vector<1x1xf32> to vector<1x1x1xf32>
    tpu.vector_store %arg3[%c0_11, %c0_12, %c0_13], %35 {strides = array<i32>} : memref<1x1x1xf32, #tpu.memory_space<vmem>>, vector<1x1x1xf32>,
    return
  }
  func.func @transform_0(%arg0: i32) -> (i32, i32) {
    %c0_i32 = arith.constant 0 : i32
    %c0_i32_0 = arith.constant 0 : i32
    return %arg0, %c0_i32 : i32, i32
  }
  func.func @transform_1(%arg0: i32) -> (i32, i32) {
    %c0_i32 = arith.constant 0 : i32
    %c0_i32_0 = arith.constant 0 : i32
    return %arg0, %c0_i32 : i32, i32
  }
  func.func @transform_2(%arg0: i32) -> (i32, i32, i32) {
    %c0_i32 = arith.constant 0 : i32
    %c0_i32_0 = arith.constant 0 : i32
    %c0_i32_1 = arith.constant 0 : i32
    return %arg0, %c0_i32, %c0_i32_0 : i32, i32, i32
  }
}

</mosaic_0001>

<bundles_post_ra>
// kernel: tpu_custom_call.1
= control target key start
LH: loop header
LB: loop body
LE: loop exit
PB: predicated region body
PF: predicated region fallthrough
CT: control target
= control target key end

     0   :  { %vm42_vm0 = vcmask 130048   ;;  %v212_v6 = vmov 0   ;;  %s299_s0 = inlined_call_operand.vmem [shape: f32[32,16], index: 0, kind: input, shape index: {}]   ;;  %s300_s1 = inlined_call_operand.vmem [shape: s32[32,1], index: 1, kind: input, shape index: {}]   ;;  %s301_s2 = inlined_call_operand.hbm [shape: f32[1,1,1], index: 2, kind: output, shape index: {}]  }
   0x1   :  { %v12_v0 = vld [vmem:[%s299_s0] sm:$0xff]  ;;  %v14_v1 = vld [vmem:[%s299_s0 + $0x10] sm:$0xff]  ;;  %v238_v2 = vld [vmem:[%s299_s0 + $0x8] sm:$0xff]  ;;  %163 = vset.pattern.permute.xlu1 %v212_v6  ;;  %162 = vset.pattern.permute.xlu0 %v212_v6 }
   0x2   :  { %v55_v3 = vsel %vm42_vm0, %v12_v0, -inf  ;;  %v61_v4 = vsel %vm42_vm0, %v14_v1, -inf  ;;  %v245_v5 = vld [vmem:[%s299_s0 + $0x18] sm:$0xff] }
   0x3   :  { %56 = vmax.xlane.f32.xlu0 %v55_v3  ;;  %62 = vmax.xlane.f32.xlu1 %v61_v4 }
   0x4   :  { %7 = vsyncpa [#allocation3], 0  ;;  %v58_v7 = vsel %vm42_vm0, %v238_v2, -inf  ;;  %v64_v8 = vsel %vm42_vm0, %v245_v5, -inf  ;;  %v17_v9 = vld [vmem:[%s300_s1 + $0x8] sm:$0xff]  ;;  %v18_v10 = vld [vmem:[%s300_s1 + $0x10] sm:$0xff]  ;;  %v20_v26 = vlaneseq }
   0x5   :  { %v16_v11 = vld [vmem:[%s300_s1] sm:$0xff]  ;;  %v19_v12 = vld [vmem:[%s300_s1 + $0x18] sm:$0xff]  ;;  %s213_s1 = smov [#allocation2]   ;;  %vm144_vm5 = vcmask 0  }
   0x6   :  { %v21_v27 = vand.u32 127, %v20_v26  ;;  %s152_s24 = sshll.u32 %s213_s1, 4  ;;  %s153_s24 = int_to_ptr.vmem [resolvable:$true] %s152_s24 }
   0x7   :  { %59 = vmax.xlane.f32.xlu0 %v58_v7  ;;  %65 = vmax.xlane.f32.xlu1 %v64_v8  ;;  %s188_s25 = scalar_lea.vmem %s153_s24, 16  ;;  %s192_s26 = scalar_lea.vmem %s153_s24, 32 }
   0x8   :  { %p189_p0 = scmp.ne.s32.totalorder %s153_s24, %s188_s25  ;;  %p193_p1 = scmp.lt.s32.totalorder %s153_s24, %s153_s24 }
   0x9   :  { %p194_p2 = scmp.lt.s32.totalorder %s192_s26, %s188_s25 }
   0xb   :  { %p195_p3 = por %p194_p2, %p193_p1 }
   0xd   :  { %p196_p4 = pnand %p195_p3, %p189_p0 }
  0x18   :  { %26 = vperm.xlu1 %163, %v17_v9  }
  0x1c   :  { %29 = vperm.xlu1 %163, %v18_v10  }
  0x1d   :  { %23 = vperm.xlu0 %162, %v16_v11  }
  0x20   :  { %32 = vperm.xlu1 %163, %v19_v12  }
  0x90   :  { %v57_v13 = vpop.xlane.xlu0 %56  ;;  %v263_v14 = vpop.xlane.xlu1 %62 }
  0x91   :  { %v67_v15 = vsub.f32 %v12_v0, %v57_v13  ;;  %v69_v16 = vsub.f32 %v14_v1, %v263_v14 }
  0x93   :  { %v71_v17 = vmul.f32 1.442695, %v67_v15  ;;  %v75_v18 = vmul.f32 1.442695, %v69_v16 }
  0x94   :  { %v266_v19 = vpop.xlane.xlu0 %59  ;;  %v268_v20 = vpop.xlane.xlu1 %65 }
  0x95   :  { %164 = vpow2.f32 %v71_v17  ;;  %v68_v21 = vsub.f32 %v238_v2, %v266_v19  ;;  %v70_v22 = vsub.f32 %v245_v5, %v268_v20 }
  0x96   :  { %166 = vpow2.f32 %v75_v18 }
  0x97   :  { %v73_v23 = vmul.f32 1.442695, %v68_v21  ;;  %v77_v24 = vmul.f32 1.442695, %v70_v22 }
  0x98   :  { %v27_v25 = vpop.permute.xlu1 %26 }
  0x99   :  { %168 = vpow2.f32 %v73_v23  ;;  %vm35_vm3 = vcmp.eq.s32.totalorder %v21_v27, %v27_v25 }
  0x9a   :  { %170 = vpow2.f32 %v77_v24  ;;  %v39_v43 = vsel %vm35_vm3, %v238_v2, 0.0 }
  0x9b   :  { %v46_v44 = vsel %vm42_vm0, %v39_v43, 0.0 }
  0x9c   :  { %v30_v29 = vpop.permute.xlu1 %29  ;;  %v24_v32 = vpop.permute.xlu0 %23 }
  0x9d   :  { %vm36_vm1 = vcmp.eq.s32.totalorder %v21_v27, %v30_v29  ;;  %vm34_vm2 = vcmp.eq.s32.totalorder %v21_v27, %v24_v32 }
  0x9e   :  { %v40_v35 = vsel %vm36_vm1, %v14_v1, 0.0  ;;  %v38_v40 = vsel %vm34_vm2, %v12_v0, 0.0 }
  0x9f   :  { %v165_v28 = vpop.eup %164  ;;  %v49_v39 = vsel %vm42_vm0, %v40_v35, 0.0  ;;  %v43_v41 = vsel %vm42_vm0, %v38_v40, 0.0 }
  0xa0   :  { %v167_v30 = vpop.eup %166  ;;  %v79_v31 = vsel %vm42_vm0, %v165_v28, 0.0  ;;  %v33_v42 = vpop.permute.xlu1 %32 }
  0xa1   :  { %80 = vadd.xlane.f32.xlu1 %v79_v31  ;;  %v85_v33 = vsel %vm42_vm0, %v167_v30, 0.0  ;;  %vm37_vm4 = vcmp.eq.s32.totalorder %v21_v27, %v33_v42 }
  0xa2   :  { %v41_v45 = vsel %vm37_vm4, %v245_v5, 0.0 }
  0xa3   :  { %v169_v34 = vpop.eup %168  ;;  %v52_v46 = vsel %vm42_vm0, %v41_v45, 0.0 }
  0xa4   :  { %v171_v36 = vpop.eup %170  ;;  %v82_v37 = vsel %vm42_vm0, %v169_v34, 0.0 }
  0xa5   :  { %86 = vadd.xlane.f32.xlu1 %v85_v33  ;;  %83 = vadd.xlane.f32.xlu0 %v82_v37  ;;  %v88_v38 = vsel %vm42_vm0, %v171_v36, 0.0 }
  0xa9   :  { %89 = vadd.xlane.f32.xlu1 %v88_v38  ;;  %50 = vadd.xlane.f32.xlu0 %v49_v39 }
  0xad   :  { %44 = vadd.xlane.f32.xlu1 %v43_v41 }
  0xb1   :  { %47 = vadd.xlane.f32.xlu1 %v46_v44 }
  0xb5   :  { %53 = vadd.xlane.f32.xlu1 %v52_v46 }
 0x12e   :  { %v81_v47 = vpop.xlane.xlu1 %80 }
 0x12f   :  { %172 = vlog2.f32 %v81_v47 }
 0x132   :  { %v87_v48 = vpop.xlane.xlu1 %86  ;;  %v84_v49 = vpop.xlane.xlu0 %83 }
 0x133   :  { %174 = vlog2.f32 %v87_v48 }
 0x134   :  { %176 = vlog2.f32 %v84_v49 }
 0x136   :  { %v90_v50 = vpop.xlane.xlu1 %89  ;;  %v51_v0 = vpop.xlane.xlu0 %50 }
 0x137   :  { %178 = vlog2.f32 %v90_v50 }
 0x139   :  { %v173_v51 = vpop.eup %172 }
 0x13a   :  { %v92_v52 = vmul.f32 0.6931472, %v173_v51  ;;  %v45_v53 = vpop.xlane.xlu1 %44 }
 0x13c   :  { %v99_v54 = vadd.f32 %v92_v52, %v57_v13 }
 0x13d   :  { %v175_v55 = vpop.eup %174 }
 0x13e   :  { %v177_v56 = vpop.eup %176  ;;  %v96_v57 = vmul.f32 0.6931472, %v175_v55  ;;  %v103_v58 = vsub.f32 %v99_v54, %v45_v53  ;;  %v48_v60 = vpop.xlane.xlu1 %47 }
 0x13f   :  { %v94_v59 = vmul.f32 0.6931472, %v177_v56 }
 0x140   :  { %v107_v61 = vsub.f32 0.0, %v103_v58  ;;  %v101_v62 = vadd.f32 %v96_v57, %v263_v14 }
 0x141   :  { %v179_v63 = vpop.eup %178  ;;  %v100_v1 = vadd.f32 %v94_v59, %v266_v19 }
 0x142   :  { %v98_v2 = vmul.f32 0.6931472, %v179_v63  ;;  %v111_v3 = vmul.f32 1.442695, %v107_v61  ;;  %v105_v4 = vsub.f32 %v101_v62, %v51_v0  ;;  %v54_v9 = vpop.xlane.xlu1 %53 }
 0x143   :  { %v104_v5 = vsub.f32 %v100_v1, %v48_v60 }
 0x144   :  { %180 = vpow2.f32 %v111_v3  ;;  %v109_v6 = vsub.f32 0.0, %v105_v4  ;;  %v102_v7 = vadd.f32 %v98_v2, %v268_v20 }
 0x145   :  { %v108_v8 = vsub.f32 0.0, %v104_v5 }
 0x146   :  { %v115_v10 = vmul.f32 1.442695, %v109_v6  ;;  %v106_v11 = vsub.f32 %v102_v7, %v54_v9 }
 0x147   :  { %v113_v12 = vmul.f32 1.442695, %v108_v8 }
 0x148   :  { %182 = vpow2.f32 %v115_v10  ;;  %v110_v13 = vsub.f32 0.0, %v106_v11 }
 0x149   :  { %184 = vpow2.f32 %v113_v12 }
 0x14a   :  { %v117_v14 = vmul.f32 1.442695, %v110_v13 }
 0x14c   :  { %186 = vpow2.f32 %v117_v14 }
 0x14e   :  { %v181_v15 = vpop.eup %180 }
 0x14f   :  { %v119_v16 = vsub.f32 1.0, %v181_v15 }
 0x151   :  { %v123_v18 = vmax.f32 %v119_v16, 0.0 }
 0x152   :  { %v183_v17 = vpop.eup %182 }
 0x153   :  { %v185_v19 = vpop.eup %184  ;;  %v121_v21 = vsub.f32 1.0, %v183_v17  ;;  %v127_v20 = vmul.f32 %v123_v18, %v123_v18 }
 0x154   :  { %v120_v22 = vsub.f32 1.0, %v185_v19 }
 0x155   :  { %v125_v23 = vmax.f32 %v121_v21, 0.0  ;;  %v131_v30 = vmul.f32 %v127_v20, %v103_v58 }
 0x156   :  { %v187_v24 = vpop.eup %186  ;;  %v124_v25 = vmax.f32 %v120_v22, 0.0 }
 0x157   :  { %v122_v26 = vsub.f32 1.0, %v187_v24  ;;  %v129_v27 = vmul.f32 %v125_v23, %v125_v23 }
 0x158   :  { %v128_v28 = vmul.f32 %v124_v25, %v124_v25 }
 0x159   :  { %v126_v29 = vmax.f32 %v122_v26, 0.0  ;;  %v133_v33 = vmul.f32 %v129_v27, %v105_v4 }
 0x15a   :  { %v132_v31 = vmul.f32 %v128_v28, %v104_v5 }
 0x15b   :  { %v130_v32 = vmul.f32 %v126_v29, %v126_v29 }
 0x15c   :  { %v135_v34 = vadd.f32 %v132_v31, %v131_v30 }
 0x15d   :  { %v134_v35 = vmul.f32 %v130_v32, %v106_v11 }
 0x15e   :  { %v136_v36 = vadd.f32 %v135_v34, %v133_v33 }
 0x160   :  { %v137_v37 = vadd.f32 %v136_v36, %v134_v35 }
 0x162   :  { %v138_v38 = vrot.slane %v137_v37, 4 }
 0x164   :  { %v139_v39 = vadd.f32 %v138_v38, %v137_v37 }
 0x166   :  { %v140_v40 = vrot.slane %v139_v39, 2 }
 0x168   :  { %v141_v41 = vadd.f32 %v140_v40, %v139_v39 }
 0x16a   :  { %v142_v42 = vrot.slane %v141_v41, 1 }
 0x16c   :  { %v143_v43 = vadd.f32 %v142_v42, %v141_v41 }
 0x16e   :  { %145 = vst.msk [vmem:[#allocation2] sm:$0x1] %vm144_vm5, %v143_v43 }
 0x16f   :  { %199 = shalt.err (!%p196_p4)
}
 0x170   :  { %s200_s29 = scalar_lea.hbm %s301_s2, 16 }
 0x171   :  { %p201_p5 = scmp.ne.s32.totalorder %s301_s2, %s200_s29  ;;  %p204_p6 = scmp.lt.u32.totalorder %s200_s29, %s301_s2 }
 0x173   :  { %p206_p7 = pnand %p204_p6, %p201_p5 }
 0x175   :  { %209 = shalt.err (!%p206_p7)
}
 0x176   :  { %155 = dma.vmem_to_hbm [thread:$0]  %s153_s24, 16, %s301_s2, [#allocation3]  }
 0x177   :  { %210 = dma.done.wait [#allocation3], 16  }
 0x178   :  { %211 = vsyncadd [#allocation3], 4294967280 }
 0x179   :  { %159 = vsyncpa [#allocation3], 1 }

</bundles_post_ra>
